<compile_context>
chip_gen: v6e
topology: v6e:2x2x1
jax: 0.10.0
libtpu: 0.0.40
codegen_flags: <defaults>
</compile_context>

<pallas_src>
import functools
from math import sqrt

import jax
import jax.numpy as jnp
from jax.experimental import pallas as pl
from jax.experimental.pallas import tpu as pltpu


def actor_kernel(x_ref, w1_ref, b1_ref, w2_ref, b2_ref, wh_ref, bh_ref,
                 out_ref, *, log_std_min, log_std_max, action_dim):
    x = x_ref[...]

    # fc1 + ReLU
    h1 = jnp.dot(x, w1_ref[...], preferred_element_type=jnp.float32) + b1_ref[...]
    h1 = jnp.maximum(h1, 0.0)

    # fc2 + ReLU
    h2 = jnp.dot(h1, w2_ref[...], preferred_element_type=jnp.float32) + b2_ref[...]
    h2 = jnp.maximum(h2, 0.0)

    # fused heads: lanes [0, action_dim) -> mean, [action_dim, 2*action_dim) -> log_std
    heads = jnp.dot(h2, wh_ref[...], preferred_element_type=jnp.float32) + bh_ref[...]

    # Pure elementwise select (no cross-lane slicing/concat inside the kernel):
    # mean passes through untouched, log_std half gets clip + exp.
    col = jax.lax.broadcasted_iota(jnp.int32, heads.shape, dimension=1)
    std_half = jnp.exp(jnp.clip(heads, log_std_min, log_std_max))
    out_ref[...] = jnp.where(col < action_dim, heads, std_half).astype(out_ref.dtype)


def tanh_gaussian_actor_forward(x, params, log_std_min, log_std_max, *, block_b=512):
    """x: [B, input_dim] float32. Returns (mean, std), each [B, action_dim]."""
    w1, b1, w2, b2, wm, bm, ws, bs = params
    B, input_dim = x.shape
    hidden = w1.shape[1]
    action_dim = wm.shape[1]
    out_dim = 2 * action_dim

    # Fuse the two heads (done once here, outside the kernel).
    wh = jnp.concatenate([wm, ws], axis=1)   # [hidden, 2*action_dim]
    bh = jnp.concatenate([bm, bs], axis=1)   # [1, 2*action_dim]

    # Batch tile: multiple of 8 sublanes, capped at block_b; pad B up if needed.
    TB = min(block_b, B)
    TB = max(8, ((TB + 7) // 8) * 8)
    B_pad = -(-B // TB) * TB
    xp = x if B_pad == B else jnp.pad(x, ((0, B_pad - B), (0, 0)))

    kernel = functools.partial(
        actor_kernel,
        log_std_min=float(log_std_min),
        log_std_max=float(log_std_max),
        action_dim=int(action_dim),
    )

    def full(shape):
        # Full-array block, constant index map -> stays resident across grid steps.
        return pl.BlockSpec(shape, lambda i: (0, 0))

    out = pl.pallas_call(
        kernel,
        out_shape=jax.ShapeDtypeStruct((B_pad, out_dim), jnp.float32),
        grid=(B_pad // TB,),
        in_specs=[
            pl.BlockSpec((TB, input_dim), lambda i: (i, 0)),   # x tile
            full((input_dim, hidden)),                         # w1
            full((1, hidden)),                                 # b1
            full((hidden, hidden)),                            # w2
            full((1, hidden)),                                 # b2
            full((hidden, out_dim)),                           # fused head weight
            full((1, out_dim)),                                # fused head bias
        ],
        out_specs=pl.BlockSpec((TB, out_dim), lambda i: (i, 0)),
        compiler_params=pltpu.CompilerParams(
            dimension_semantics=("parallel",)),
    )(xp, w1, b1, w2, b2, wh, bh)

    mean = out[:B, :action_dim]
    std = out[:B, action_dim:]
    return mean, std


def init_params(key, input_dim, action_dim, hidden_size):
    """Deterministic init mirroring `initialization_fc`:
    each Linear layer's weight/bias ~ U(-1/sqrt(fan_in), 1/sqrt(fan_in)).
    Weights returned pre-transposed as [in, out]; biases as [1, out]."""
    def linear(k, fan_in, fan_out):
        kw, kb = jax.random.split(k)
        bound = 1.0 / sqrt(fan_in)
        w = jax.random.uniform(kw, (fan_in, fan_out), jnp.float32, -bound, bound)
        b = jax.random.uniform(kb, (1, fan_out), jnp.float32, -bound, bound)
        return w, b

    k1, k2, k3, k4 = jax.random.split(key, 4)
    w1, b1 = linear(k1, input_dim, hidden_size)
    w2, b2 = linear(k2, hidden_size, hidden_size)
    wm, bm = linear(k3, hidden_size, action_dim)
    ws, bs = linear(k4, hidden_size, action_dim)
    return (w1, b1, w2, b2, wm, bm, ws, bs)


def reference_forward(x, params, log_std_min, log_std_max):
    """Plain-JAX reference for correctness check."""
    w1, b1, w2, b2, wm, bm, ws, bs = params
    h = jnp.maximum(x @ w1 + b1, 0.0)
    h = jnp.maximum(h @ w2 + b2, 0.0)
    mean = h @ wm + bm
    log_std = jnp.clip(h @ ws + bs, log_std_min, log_std_max)
    return mean, jnp.exp(log_std)


if __name__ == "__main__":
    # Small shapes consistent with the module's MLP forward.
    batch = 8
    input_dim = 16
    action_dim = 8
    hidden_size = 32
    log_std_min, log_std_max = -20.0, 2.0

    key = jax.random.PRNGKey(0)
    k_params, k_x = jax.random.split(key)
    params = init_params(k_params, input_dim, action_dim, hidden_size)
    x = jax.random.normal(k_x, (batch, input_dim), jnp.float32)

    mean, std = tanh_gaussian_actor_forward(x, params, log_std_min, log_std_max)
    mean = jax.block_until_ready(mean)
    std = jax.block_until_ready(std)

    # Sanity check against plain-JAX reference.
    mean_ref, std_ref = reference_forward(x, params, log_std_min, log_std_max)
    assert mean.shape == (batch, action_dim) and std.shape == (batch, action_dim)
    assert jnp.allclose(mean, mean_ref, atol=1e-5, rtol=1e-5)
    assert jnp.allclose(std, std_ref, atol=1e-5, rtol=1e-5)

    # Also exercise a batch that is not a tile multiple (padding path) and
    # large enough to use the batch grid.
    k_x2 = jax.random.PRNGKey(7)
    x2 = jax.random.normal(k_x2, (1037, input_dim), jnp.float32)
    m2, s2 = tanh_gaussian_actor_forward(x2, params, log_std_min, log_std_max)
    m2 = jax.block_until_ready(m2)
    s2 = jax.block_until_ready(s2)
    m2_ref, s2_ref = reference_forward(x2, params, log_std_min, log_std_max)
    assert jnp.allclose(m2, m2_ref, atol=1e-5, rtol=1e-5)
    assert jnp.allclose(s2, s2_ref, atol=1e-5, rtol=1e-5)

    print("KERNEL_OK")
</pallas_src>

<mosaic_0001>
module attributes {stable_mosaic.version = 11 : i64} {
  func.func @actor_kernel(%arg0: i32, %arg1: memref<8x16xf32, #tpu.memory_space<vmem>>, %arg2: memref<16x32xf32, #tpu.memory_space<vmem>>, %arg3: memref<1x32xf32, #tpu.memory_space<vmem>>, %arg4: memref<32x32xf32, #tpu.memory_space<vmem>>, %arg5: memref<1x32xf32, #tpu.memory_space<vmem>>, %arg6: memref<32x16xf32, #tpu.memory_space<vmem>>, %arg7: memref<1x16xf32, #tpu.memory_space<vmem>>, %arg8: memref<8x16xf32, #tpu.memory_space<vmem>>) attributes {dimension_semantics = [#tpu.dimension_semantics<parallel>], iteration_bounds = array<i64: 1>, scalar_prefetch = 0 : i64, scratch_operands = 0 : i64, tpu.core_type = #tpu.core_type<tc>, window_params = [{transform_indices = @transform_0, window_bounds = array<i64: 8, 16>}, {pipeline_mode = #tpu.pipeline_mode<synchronous>, transform_indices = @transform_1, window_bounds = array<i64: 16, 32>}, {pipeline_mode = #tpu.pipeline_mode<synchronous>, transform_indices = @transform_2, window_bounds = array<i64: 1, 32>}, {pipeline_mode = #tpu.pipeline_mode<synchronous>, transform_indices = @transform_3, window_bounds = array<i64: 32, 32>}, {pipeline_mode = #tpu.pipeline_mode<synchronous>, transform_indices = @transform_4, window_bounds = array<i64: 1, 32>}, {pipeline_mode = #tpu.pipeline_mode<synchronous>, transform_indices = @transform_5, window_bounds = array<i64: 32, 16>}, {pipeline_mode = #tpu.pipeline_mode<synchronous>, transform_indices = @transform_6, window_bounds = array<i64: 1, 16>}, {transform_indices = @transform_7, window_bounds = array<i64: 8, 16>}]} {
    %c0 = arith.constant 0 : index
    %c0_0 = arith.constant 0 : index
    %0 = vector.load %arg1[%c0, %c0_0] : memref<8x16xf32, #tpu.memory_space<vmem>>, vector<8x16xf32>
    %c0_1 = arith.constant 0 : index
    %c0_2 = arith.constant 0 : index
    %1 = vector.load %arg2[%c0_1, %c0_2] : memref<16x32xf32, #tpu.memory_space<vmem>>, vector<16x32xf32>
    %cst = arith.constant dense<0.000000e+00> : vector<8x32xf32>
    %2 = tpu.matmul %0, %1, %cst {dimension_numbers = #tpu.dot_dimension_numbers<[1], [0], [0], [1], [0, 0, 1, 1], [], []>} : vector<8x16xf32>, vector<16x32xf32>, vector<8x32xf32> -> vector<8x32xf32>
    %c0_3 = arith.constant 0 : index
    %c0_4 = arith.constant 0 : index
    %3 = vector.load %arg3[%c0_3, %c0_4] : memref<1x32xf32, #tpu.memory_space<vmem>>, vector<1x32xf32>
    %4 = vector.broadcast %3 : vector<1x32xf32> to vector<8x32xf32>
    %5 = arith.addf %2, %4 : vector<8x32xf32>
    %cst_5 = arith.constant 0.000000e+00 : f32
    %6 = vector.broadcast %cst_5 : f32 to vector<8x32xf32>
    %7 = arith.maximumf %5, %6 : vector<8x32xf32>
    %c0_6 = arith.constant 0 : index
    %c0_7 = arith.constant 0 : index
    %8 = vector.load %arg4[%c0_6, %c0_7] : memref<32x32xf32, #tpu.memory_space<vmem>>, vector<32x32xf32>
    %cst_8 = arith.constant dense<0.000000e+00> : vector<8x32xf32>
    %9 = tpu.matmul %7, %8, %cst_8 {dimension_numbers = #tpu.dot_dimension_numbers<[1], [0], [0], [1], [0, 0, 1, 1], [], []>} : vector<8x32xf32>, vector<32x32xf32>, vector<8x32xf32> -> vector<8x32xf32>
    %c0_9 = arith.constant 0 : index
    %c0_10 = arith.constant 0 : index
    %10 = vector.load %arg5[%c0_9, %c0_10] : memref<1x32xf32, #tpu.memory_space<vmem>>, vector<1x32xf32>
    %11 = vector.broadcast %10 : vector<1x32xf32> to vector<8x32xf32>
    %12 = arith.addf %9, %11 : vector<8x32xf32>
    %cst_11 = arith.constant 0.000000e+00 : f32
    %13 = vector.broadcast %cst_11 : f32 to vector<8x32xf32>
    %14 = arith.maximumf %12, %13 : vector<8x32xf32>
    %c0_12 = arith.constant 0 : index
    %c0_13 = arith.constant 0 : index
    %15 = vector.load %arg6[%c0_12, %c0_13] : memref<32x16xf32, #tpu.memory_space<vmem>>, vector<32x16xf32>
    %cst_14 = arith.constant dense<0.000000e+00> : vector<8x16xf32>
    %16 = tpu.matmul %14, %15, %cst_14 {dimension_numbers = #tpu.dot_dimension_numbers<[1], [0], [0], [1], [0, 0, 1, 1], [], []>} : vector<8x32xf32>, vector<32x16xf32>, vector<8x16xf32> -> vector<8x16xf32>
    %c0_15 = arith.constant 0 : index
    %c0_16 = arith.constant 0 : index
    %17 = vector.load %arg7[%c0_15, %c0_16] : memref<1x16xf32, #tpu.memory_space<vmem>>, vector<1x16xf32>
    %18 = vector.broadcast %17 : vector<1x16xf32> to vector<8x16xf32>
    %19 = arith.addf %16, %18 : vector<8x16xf32>
    %20 = tpu.iota {dimensions = array<i32: 1>} : vector<8x16xi32>
    %cst_17 = arith.constant -2.000000e+01 : f32
    %cst_18 = arith.constant 2.000000e+00 : f32
    %21 = vector.broadcast %cst_17 : f32 to vector<8x16xf32>
    %22 = arith.maximumf %21, %19 : vector<8x16xf32>
    %23 = vector.broadcast %cst_18 : f32 to vector<8x16xf32>
    %24 = arith.minimumf %23, %22 : vector<8x16xf32>
    %25 = math.exp %24 : vector<8x16xf32>
    %c8_i32 = arith.constant 8 : i32
    %26 = vector.broadcast %c8_i32 : i32 to vector<8x16xi32>
    %27 = arith.cmpi slt, %20, %26 : vector<8x16xi32>
    %28 = arith.select %27, %19, %25 : vector<8x16xi1>, vector<8x16xf32>
    %c0_19 = arith.constant 0 : index
    %c0_20 = arith.constant 0 : index
    %29 = vector.load %arg8[%c0_19, %c0_20] : memref<8x16xf32, #tpu.memory_space<vmem>>, vector<8x16xf32>
    tpu.vector_store %arg8[%c0_19, %c0_20], %28 {strides = array<i32>} : memref<8x16xf32, #tpu.memory_space<vmem>>, vector<8x16xf32>,
    return
  }
  func.func @transform_0(%arg0: i32) -> (i32, i32) {
    %c0_i32 = arith.constant 0 : i32
    %c0_i32_0 = arith.constant 0 : i32
    return %arg0, %c0_i32 : i32, i32
  }
  func.func @transform_1(%arg0: i32) -> (i32, i32) {
    %c0_i32 = arith.constant 0 : i32
    %c0_i32_0 = arith.constant 0 : i32
    %c0_i32_1 = arith.constant 0 : i32
    return %c0_i32, %c0_i32_0 : i32, i32
  }
  func.func @transform_2(%arg0: i32) -> (i32, i32) {
    %c0_i32 = arith.constant 0 : i32
    %c0_i32_0 = arith.constant 0 : i32
    %c0_i32_1 = arith.constant 0 : i32
    return %c0_i32, %c0_i32_0 : i32, i32
  }
  func.func @transform_3(%arg0: i32) -> (i32, i32) {
    %c0_i32 = arith.constant 0 : i32
    %c0_i32_0 = arith.constant 0 : i32
    %c0_i32_1 = arith.constant 0 : i32
    return %c0_i32, %c0_i32_0 : i32, i32
  }
  func.func @transform_4(%arg0: i32) -> (i32, i32) {
    %c0_i32 = arith.constant 0 : i32
    %c0_i32_0 = arith.constant 0 : i32
    %c0_i32_1 = arith.constant 0 : i32
    return %c0_i32, %c0_i32_0 : i32, i32
  }
  func.func @transform_5(%arg0: i32) -> (i32, i32) {
    %c0_i32 = arith.constant 0 : i32
    %c0_i32_0 = arith.constant 0 : i32
    %c0_i32_1 = arith.constant 0 : i32
    return %c0_i32, %c0_i32_0 : i32, i32
  }
  func.func @transform_6(%arg0: i32) -> (i32, i32) {
    %c0_i32 = arith.constant 0 : i32
    %c0_i32_0 = arith.constant 0 : i32
    %c0_i32_1 = arith.constant 0 : i32
    return %c0_i32, %c0_i32_0 : i32, i32
  }
  func.func @transform_7(%arg0: i32) -> (i32, i32) {
    %c0_i32 = arith.constant 0 : i32
    %c0_i32_0 = arith.constant 0 : i32
    return %arg0, %c0_i32 : i32, i32
  }
}

</mosaic_0001>

<bundles_post_ra>
// kernel: tpu_custom_call.1
= control target key start
LH: loop header
LB: loop body
LE: loop exit
PB: predicated region body
PF: predicated region fallthrough
CT: control target
= control target key end

     0   :  { %12 = vsyncpa [#allocation3], 0  ;;  %s512_s0 = inlined_call_operand.hbm [shape: f32[8,16], index: 0, kind: input, shape index: {}]   ;;  %s513_s1 = inlined_call_operand.vmem [shape: f32[16,32], index: 1, kind: input, shape index: {}]   ;;  %s514_s2 = inlined_call_operand.vmem [shape: f32[1,32], index: 2, kind: input, shape index: {}]   ;;  %s515_s3 = inlined_call_operand.vmem [shape: f32[32,32], index: 3, kind: input, shape index: {}]   ;;  %s516_s4 = inlined_call_operand.vmem [shape: f32[1,32], index: 4, kind: input, shape index: {}]   ;;  %s517_s5 = inlined_call_operand.vmem [shape: f32[32,16], index: 5, kind: input, shape index: {}]   ;;  %s518_s6 = inlined_call_operand.vmem [shape: f32[1,16], index: 6, kind: input, shape index: {}]   ;;  %s519_s7 = inlined_call_operand.hbm [shape: f32[8,16], index: 7, kind: output, shape index: {}]  }
   0x1   :  { %13 = vsyncpa [#allocation4], 0  ;;  %s416_s24 = smov [#allocation2]  }
   0x2   :  { %s20_s25 = sshll.u32 %s416_s24, 4  ;;  %s21_s25 = int_to_ptr.vmem [resolvable:$true] %s20_s25 }
   0x3   :  { %s380_s26 = scalar_lea.vmem %s21_s25, 128  ;;  %p385_p1 = scmp.lt.s32.totalorder %s21_s25, %s21_s25 }
   0x4   :  { %p381_p0 = scmp.ne.s32.totalorder %s21_s25, %s380_s26  ;;  %p386_p2 = scmp.lt.s32.totalorder %s380_s26, %s380_s26 }
   0x6   :  { %p387_p3 = por %p386_p2, %p385_p1 }
   0x8   :  { %p388_p4 = pnand %p387_p3, %p381_p0 }
   0xa   :  { %391 = shalt.err (!%p388_p4)
}
   0xb   :  { %23 = dma.hbm_to_vmem [thread:$0]  %s512_s0, 128, %s21_s25, [#allocation3]  }
   0xc   :  { %412 = dma.done.wait [#allocation3], 128  }
   0xd   :  { %413 = vsyncadd [#allocation3], 4294967168  ;;  %v417_v0 = vmov 0.0   ;;  %vm418_vm0 = vmmov 0   ;;  %v41_v1 = vld [vmem:[%s513_s1 + $0x8] sm:$0xff]  ;;  %v40_v2 = vld [vmem:[%s513_s1] sm:$0xff]  ;;  %v294_v29 = vlaneseq }
   0xe   :  { %337 = vmatprep.subr.mxu0 %v417_v0  ;;  %341 = vmatprep.mubr.msk.f32.mxu0 %vm418_vm0, %v417_v0  ;;  %v39_v3 = vld [vmem:[#allocation2] sm:$0xff]  ;;  %vm49_vm1 = vcmask 130048   ;;  %v127_v4 = vld [vmem:[%s515_s3 + $0x18] sm:$0xff]  ;;  %v126_v5 = vld [vmem:[%s515_s3 + $0x10] sm:$0xff]  ;;  %vm135_vm2 = vcmask 261120  }
   0xf   :  { %344 = vmatprep.subr.mxu1 %v417_v0  ;;  %352 = vmatprep.mubr.msk.f32.mxu1 %vm418_vm0, %v417_v0  ;;  %v125_v6 = vld [vmem:[%s515_s3 + $0x8] sm:$0xff]  ;;  %v124_v7 = vld [vmem:[%s515_s3] sm:$0xff]  ;;  %v213_v8 = vld [vmem:[%s517_s5 + $0x18] sm:$0xff]  ;;  %v295_v30 = vand.u32 127, %v294_v29 }
  0x10   :  { %338 = vmatpush3.msra.mxu0 %v41_v1  ;;  %345 = vmatpush3.msra.mxu1 %v127_v4  ;;  %v318_v9 = vld [vmem:[%s514_s2] ss:$0 sm:$0xff]  ;;  %v212_v14 = vld [vmem:[%s517_s5 + $0x10] sm:$0xff]  ;;  %v211_v15 = vld [vmem:[%s517_s5 + $0x8] sm:$0xff] }
  0x11   :  { %339 = vmatprep.subr.mxu0 %v417_v0  ;;  %346 = vmatprep.subr.mxu1 %v417_v0  ;;  %v210_v16 = vld [vmem:[%s517_s5] sm:$0xff]  ;;  %vm300_vm3 = vcmp.lt.s32.totalorder %v295_v30, 8 }
  0x12   :  { %340 = vmatpush3.msra.mxu0 %v40_v2  ;;  %347 = vmatpush3.msra.mxu1 %v126_v5  ;;  %v320_v17 = vld [vmem:[%s516_s4] ss:$0 sm:$0xff]  ;;  %s419_s4 = smov [#allocation5]  }
  0x13   :  { %342 = vmatmul.mubr.msk.f32.vlgmr.msra.gmra.mxu0 %vm49_vm1, %v39_v3  ;;  %355 = vmatprep.subr.mxu0 %v417_v0  ;;  %v322_v22 = vld [vmem:[%s518_s6] ss:$0 sm:$0xff]  ;;  %s309_s5 = sshll.u32 %s419_s4, 4  ;;  %s310_s5 = int_to_ptr.vmem [resolvable:$true] %s309_s5 }
  0x14   :  { %363 = vmatprep.mubr.msk.f32.mxu0 %vm418_vm0, %v417_v0  ;;  %348 = vmatprep.subr.mxu1 %v417_v0  ;;  %s392_s28 = scalar_lea.vmem %s310_s5, 128  ;;  %p397_p6 = scmp.lt.s32.totalorder %s310_s5, %s310_s5 }
  0x15   :  { %349 = vmatpush3.msra.mxu1 %v125_v6  ;;  %356 = vmatpush3.msra.mxu0 %v213_v8  ;;  %p393_p5 = scmp.ne.s32.totalorder %s310_s5, %s392_s28  ;;  %p398_p7 = scmp.lt.s32.totalorder %s392_s28, %s392_s28 }
  0x16   :  { %350 = vmatprep.subr.mxu1 %v417_v0  ;;  %357 = vmatprep.subr.mxu0 %v417_v0 }
  0x17   :  { %351 = vmatpush3.msra.mxu1 %v124_v7  ;;  %358 = vmatpush3.msra.mxu0 %v212_v14  ;;  %p399_p8 = por %p398_p7, %p397_p6 }
  0x18   :  { %359 = vmatprep.subr.mxu0 %v417_v0 }
  0x19   :  { %360 = vmatpush3.msra.mxu0 %v211_v15  ;;  %p400_p9 = pnand %p399_p8, %p393_p5 }
  0x1a   :  { %361 = vmatprep.subr.mxu0 %v417_v0 }
  0x1b   :  { %362 = vmatpush3.msra.mxu0 %v210_v16 }
  0xd3   :  { %v119_v10 = vpop.f32.mrf.mxu0 }
  0xd4   :  { %v120_v11 = vadd.f32 %v318_v9, %v119_v10 }
  0xd5   :  { %v343_v12 = vpop.f32.mrf.mxu0 }
  0xd6   :  { %v123_v13 = vmax.f32 %v120_v11, 0.0 }
  0xd8   :  { %353 = vmatmul.mubr.msk.f32.vlgmr.msra.gmra.mxu1 %vm135_vm2, %v123_v13 }
 0x198   :  { %v205_v18 = vpop.f32.mrf.mxu1 }
 0x199   :  { %v206_v19 = vadd.f32 %v320_v17, %v205_v18 }
 0x19a   :  { %v354_v20 = vpop.f32.mrf.mxu1 }
 0x19b   :  { %v209_v21 = vmax.f32 %v206_v19, 0.0 }
 0x19d   :  { %364 = vmatmul.mubr.msk.f32.vlgmr.msra.gmra.mxu0 %vm135_vm2, %v209_v21 }
 0x25d   :  { %v290_v23 = vpop.f32.mrf.mxu0 }
 0x25e   :  { %v291_v24 = vadd.f32 %v322_v22, %v290_v23 }
 0x25f   :  { %v365_v25 = vpop.f32.mrf.mxu0 }
 0x260   :  { %v296_v26 = vmax.f32 %v291_v24, -20.0 }
 0x262   :  { %v297_v27 = vmin.f32 %v296_v26, 2.0 }
 0x264   :  { %v298_v28 = vmul.f32 1.442695, %v297_v27 }
 0x266   :  { %370 = vpow2.f32 %v298_v28 }
 0x273   :  { %v371_v31 = vpop.eup %370 }
 0x274   :  { %v301_v32 = vsel %vm300_vm3, %v291_v24, %v371_v31 }
 0x275   :  { %302 = vst.msk [vmem:[#allocation5] sm:$0xff] %vm49_vm1, %v301_v32 }
 0x276   :  { %403 = shalt.err (!%p400_p9)
}
 0x277   :  { %312 = dma.vmem_to_hbm [thread:$0]  %s310_s5, 128, %s519_s7, [#allocation4]  }
 0x278   :  { %414 = dma.done.wait [#allocation4], 128  }
 0x279   :  { %415 = vsyncadd [#allocation4], 4294967168 }
 0x27a   :  { %316 = vsyncpa [#allocation3], 1 }
 0x27b   :  { %317 = vsyncpa [#allocation4], 1 }

</bundles_post_ra>
